<compile_context>
chip_gen: v5e
topology: v5e:2x2
jax: 0.10.0
libtpu: 0.0.40
codegen_flags: <defaults>
</compile_context>

<pallas_src>
import functools
import math

import jax
import jax.numpy as jnp
from jax import lax
from jax.experimental import pallas as pl
from jax.experimental.pallas import tpu as pltpu


_IDENTITY_COEFFS = (1.0, 0.0, 0.0, 0.0, 1.0, 0.0, 0.0, 0.0)
_BIG = 1e9


def _round_up(x, m):
    return ((x + m - 1) // m) * m


def _vmem_capacity_bytes():
    try:
        cap = int(pltpu.get_tpu_info().vmem_capacity_bytes)
        if cap > 0:
            return cap
    except Exception:
        pass
    return 64 * 1024 * 1024


def _band_rows(tile_h, h_pad, h, distortion_bound):
    """Static bound on the number of source rows one output row-tile can touch."""
    if distortion_bound is None:
        return h_pad
    span = int(math.ceil(1.5 * tile_h + 2.0 * float(distortion_bound) * h + 12.0))
    band = min(h_pad, _round_up(span, 8))
    if h_pad % 8 != 0:           # keep the dynamic sublane slice 8-aligned
        band = h_pad
    return band


def _plan_tiling(H, W, tile_h, distortion_bound):
    """Pick (TILE_H, H_pad, W_pad, BAND): TILE_H*W_pad is a lane-dense multiple of
    128 and the per-tile VMEM slab fits a generation-aware budget."""
    cap = _vmem_capacity_bytes()
    slab_budget = (6 << 20) if cap <= (64 << 20) else (12 << 20)

    def slab_bytes(th, hp, wp):
        pt = th * wp
        bd = _band_rows(th, hp, H, distortion_bound)
        return pt * (6 * wp + 8 * bd + 64) + 4 * hp * wp

    if tile_h is not None:
        th = int(tile_h)
        if H % th == 0 and (th * W) % 128 == 0:
            return th, H, W, _band_rows(th, H, H, distortion_bound), cap
        hp, wp = _round_up(H, 8), _round_up(W, 128)
        if hp % th == 0:
            return th, hp, wp, _band_rows(th, hp, H, distortion_bound), cap
        # otherwise fall through to the automatic plan

    cands = [(dv, H, W) for dv in range(1, H + 1)
             if H % dv == 0 and (dv * W) % 128 == 0]
    if not cands:
        hp, wp = _round_up(H, 8), _round_up(W, 128)
        cands = [(dv, hp, wp) for dv in range(1, hp + 1) if hp % dv == 0]
    fitting = [c for c in cands if slab_bytes(*c) <= slab_budget]
    th, hp, wp = (max(fitting, key=lambda c: c[0]) if fitting
                  else min(cands, key=lambda c: c[0]))
    return th, hp, wp, _band_rows(th, hp, H, distortion_bound), cap


# ----------------------------------------------------------------------------
# Fused warp + masks_to_boxes kernel
# ----------------------------------------------------------------------------
def _make_warp_boxes_kernel(H, W, H_pad, W_pad, TILE_H, BAND):
    Pt = TILE_H * W_pad
    banded = BAND < H_pad

    def kernel(coeffs_ref, flags_ref, band_ref, coord_ref, src_ref, orig_ref,
               out_ref, boxes_ref):
        n = pl.program_id(0)                # plane axis     ("parallel")
        t = pl.program_id(1)                # row-tile axis  ("arbitrary", accumulator)

        a = coeffs_ref[n, 0]; b = coeffs_ref[n, 1]; c = coeffs_ref[n, 2]
        d = coeffs_ref[n, 3]; e = coeffs_ref[n, 4]; f = coeffs_ref[n, 5]
        g = coeffs_ref[n, 6]; h = coeffs_ref[n, 7]

        # Hoisted output-pixel coordinates (tiny resident pattern, no int div/mod).
        row0_f = (t * TILE_H).astype(jnp.float32)
        xs = coord_ref[0:1, :]                                  # (1, Pt) column index
        ys = coord_ref[1:2, :] + row0_f                         # (1, Pt) row index

        # Inverse homography (output -> source): EUP reciprocal + one Newton step.
        denom = g * xs + h * ys + 1.0
        inv = pl.reciprocal(denom, approx=True)
        inv = inv * (2.0 - denom * inv)
        x_src = (a * xs + b * ys + c) * inv
        y_src = (d * xs + e * ys + f) * inv

        # Banded source-row window (start precomputed per (plane, tile) in SMEM).
        if banded:
            band0 = pl.multiple_of(band_ref[n, t], 8)
            src_band = src_ref[0, pl.ds(band0, BAND), :]        # (BAND, W_pad) bf16
            band0_f = band0.astype(jnp.float32)
        else:
            src_band = src_ref[0]                               # (H_pad, W_pad) bf16
            band0_f = jnp.float32(0.0)

        # Bilinear "hat" weights; taps outside the image / band are absent -> 0,
        # reproducing torchvision's zero fill (zero-padded lanes also contribute 0).
        xcol = lax.broadcasted_iota(jnp.int32, (W_pad, 1), 0).astype(jnp.float32)
        wxT = jnp.maximum(0.0, 1.0 - jnp.abs(xcol - x_src))     # (W_pad, Pt)
        yrow = band0_f + lax.broadcasted_iota(
            jnp.int32, (BAND, 1), 0).astype(jnp.float32)
        wy = jnp.maximum(0.0, 1.0 - jnp.abs(yrow - y_src))      # (BAND, Pt)

        # Stage 1 (MXU, N = Pt lanes): x-interpolate every banded source row.
        tmp = jnp.dot(src_band, wxT.astype(jnp.bfloat16),
                      preferred_element_type=jnp.float32)       # (BAND, Pt)
        # Stage 2 (VPU + sublane reduce): y interpolation.
        warped = jnp.sum(wy * tmp, axis=0, keepdims=True)       # (1, Pt)

        # Per-plane inner p=0.5 coin (apply) + mask re-quantization flag.
        apply_b = flags_ref[n, 0] > 0
        quant_b = flags_ref[n, 1] > 0
        sel = jnp.where(apply_b, warped, orig_ref[0])           # (1, Pt) f32
        sel = jnp.where(quant_b, jnp.floor(sel + 0.5), sel)
        out_ref[0] = sel.astype(out_ref.dtype)                  # lane-dense store

        # ---- masks_to_boxes epilogue, accumulated across row tiles ------------
        valid = (xs < W) & (ys < H)                             # drop lane/row padding
        present = (sel > 0.0) & valid

        def lane_min(v):                                        # (1, Pt) -> (1, 1)
            return jnp.min(v, axis=1, keepdims=True)

        tile_box = jnp.concatenate(
            [lane_min(jnp.where(present, xs, _BIG)),
             lane_min(jnp.where(present, ys, _BIG)),
             lane_min(jnp.where(present, -xs, _BIG)),
             lane_min(jnp.where(present, -ys, _BIG))],
            axis=1)                                             # (1, 4)

        @pl.when(t == 0)
        def _init():
            boxes_ref[0] = jnp.full((1, 4), _BIG, jnp.float32)

        boxes_ref[0] = jnp.minimum(boxes_ref[0], tile_box)

        @pl.when(t == pl.num_programs(1) - 1)
        def _finalize():
            acc = boxes_ref[0]
            lane = lax.broadcasted_iota(jnp.int32, (1, 4), 1)
            sign = jnp.where(lane < 2, 1.0, -1.0)
            has = acc < (_BIG * 0.5)            # empty plane -> accumulator == BIG
            boxes_ref[0] = jnp.where(has, acc * sign, 0.0)

    return kernel


def _band_starts(coeffs, n_tiles, tile_h, W, H_pad, band):
    """Per-(plane, row-tile) first source row, from y_src at the tile corners
    (a projective y_src attains its extrema over a rectangle at the corners)."""
    N = coeffs.shape[0]
    if band >= H_pad:
        return jnp.zeros((N, n_tiles), jnp.int32)
    t = jnp.arange(n_tiles, dtype=jnp.float32)
    y_c = jnp.stack([t * tile_h, t * tile_h + (tile_h - 1)], axis=-1)    # (T, 2)
    x_c = jnp.asarray([0.0, W - 1.0], jnp.float32)                       # (2,)
    cf = coeffs[:, :, None, None, None]                                  # (N, 8, 1, 1, 1)
    yy = y_c[None, :, :, None]                                           # (1, T, 2, 1)
    xx = x_c[None, None, None, :]                                        # (1, 1, 1, 2)
    den = cf[:, 6] * xx + cf[:, 7] * yy + 1.0
    den = jnp.where(jnp.abs(den) < 1e-6,
                    jnp.where(den < 0, -1e-6, 1e-6), den)
    ysrc = (cf[:, 3] * xx + cf[:, 4] * yy + cf[:, 5]) / den              # (N, T, 2, 2)
    lo = jnp.floor(jnp.min(ysrc, axis=(2, 3)))                           # (N, T)
    lo = jnp.nan_to_num(lo, nan=0.0, posinf=float(H_pad), neginf=0.0)
    start = jnp.clip(lo, 0.0, float(H_pad - band)).astype(jnp.int32)
    return (start // 8) * 8                                              # sublane aligned


def warp_and_boxes(planes, coeffs, apply_flags, quant_flags=None, *,
                   tile_h=None, distortion_bound=None):
    """Warp each (H, W) plane with its own output->input homography, select warped
    vs original per plane, and return per-plane tight boxes of the >0 pixels.

    planes: (N, H, W); coeffs: (N, 8); apply_flags: (N,) int (nonzero -> warp);
    quant_flags: (N,) int (nonzero -> round output, uint8-mask semantics).
    distortion_bound: None disables source-row banding (always safe); otherwise the
    coefficients must come from a perspective with at most that distortion.
    Returns (out (N, H, W) f32, boxes (N, 4) f32 [xmin, ymin, xmax, ymax], 0s if empty).
    """
    planes = planes.astype(jnp.float32)
    coeffs = coeffs.astype(jnp.float32)
    N, H, W = planes.shape
    apply_flags = jnp.asarray(apply_flags, jnp.int32).reshape(N)
    if quant_flags is None:
        quant_flags = jnp.zeros((N,), jnp.int32)
    quant_flags = jnp.asarray(quant_flags, jnp.int32).reshape(N)
    flags = jnp.stack([apply_flags, quant_flags], axis=1)                # (N, 2) SMEM

    TILE_H, H_pad, W_pad, BAND, vmem_cap = _plan_tiling(H, W, tile_h, distortion_bound)
    n_tiles = H_pad // TILE_H
    Pt = TILE_H * W_pad

    if (H_pad, W_pad) != (H, W):
        planes_p = jnp.pad(planes, ((0, 0), (0, H_pad - H), (0, W_pad - W)))
    else:
        planes_p = planes
    src_bf16 = planes_p.astype(jnp.bfloat16)                  # MXU operand, cast once
    orig_flat = planes_p.reshape(N, 1, H_pad * W_pad)         # exact f32 pass-through rows

    coords = jnp.stack(
        [jnp.tile(jnp.arange(W_pad, dtype=jnp.float32), TILE_H),
         jnp.repeat(jnp.arange(TILE_H, dtype=jnp.float32), W_pad)], axis=0)   # (2, Pt)

    band0 = _band_starts(coeffs, n_tiles, TILE_H, W, H_pad, BAND)        # (N, T) SMEM

    slab = Pt * (6 * W_pad + 8 * BAND + 64) + 4 * H_pad * W_pad
    vmem_limit = int(min(max(2 * slab + (8 << 20), 32 << 20), int(0.85 * vmem_cap)))
    vmem_limit = int(max(vmem_limit, 2 * slab + (4 << 20)))
    cost = pl.CostEstimate(
        flops=int(N * n_tiles * Pt * (2.0 * BAND * W_pad + 12.0 * (BAND + W_pad) + 24.0)),
        transcendentals=int(N * H_pad * W_pad),
        bytes_accessed=int(N * H_pad * W_pad * 10 + N * 64),
    )

    kernel = _make_warp_boxes_kernel(H, W, H_pad, W_pad, TILE_H, BAND)
    warped_flat, boxes = pl.pallas_call(
        kernel,
        grid=(N, n_tiles),
        in_specs=[
            pl.BlockSpec(memory_space=pltpu.MemorySpace.SMEM),            # coeffs (N, 8)
            pl.BlockSpec(memory_space=pltpu.MemorySpace.SMEM),            # flags  (N, 2)
            pl.BlockSpec(memory_space=pltpu.MemorySpace.SMEM),            # band0  (N, T)
            pl.BlockSpec((2, Pt), lambda n, t: (0, 0)),                   # coord pattern, resident
            pl.BlockSpec((1, H_pad, W_pad), lambda n, t: (n, 0, 0)),      # bf16 plane, resident over t
            pl.BlockSpec((1, 1, Pt), lambda n, t: (n, 0, t)),             # original rows, lane-flat
        ],
        out_specs=(
            pl.BlockSpec((1, 1, Pt), lambda n, t: (n, 0, t)),             # warped rows, lane-flat
            pl.BlockSpec((1, 1, 4), lambda n, t: (n, 0, 0)),              # per-plane box accumulator
        ),
        out_shape=(
            jax.ShapeDtypeStruct((N, 1, H_pad * W_pad), jnp.float32),
            jax.ShapeDtypeStruct((N, 1, 4), jnp.float32),
        ),
        compiler_params=pltpu.CompilerParams(
            dimension_semantics=("parallel", "arbitrary"),
            vmem_limit_bytes=vmem_limit,
        ),
        cost_estimate=cost,
    )(coeffs, flags, band0, coords, src_bf16, orig_flat)

    out = warped_flat.reshape(N, H_pad, W_pad)[:, :H, :W]
    return out, boxes.reshape(N, 4)


def masks_to_boxes(masks, *, tile_h=None):
    """masks: (M, H, W) -> boxes (M, 4) f32 [xmin, ymin, xmax, ymax] of nonzero pixels."""
    masks = masks.astype(jnp.float32)
    M = masks.shape[0]
    coeffs = jnp.tile(jnp.asarray(_IDENTITY_COEFFS, jnp.float32)[None, :], (M, 1))
    flags = jnp.zeros((M,), jnp.int32)          # apply=0 -> boxes of the input masks
    _, boxes = warp_and_boxes(masks, coeffs, flags, tile_h=tile_h)
    return boxes


# ----------------------------------------------------------------------------
# Glue: torchvision-style parameter sampling + homography solve (plain JAX, traced)
# ----------------------------------------------------------------------------
def _get_perspective_params(key, height, width, distortion):
    half_h, half_w = height // 2, width // 2
    dh = int(distortion * half_h)
    dw = int(distortion * half_w)
    ks = jax.random.split(key, 8)
    ri = lambda k, lo, hi: jax.random.randint(k, (), lo, hi).astype(jnp.float32)
    topleft = (ri(ks[0], 0, dw + 1), ri(ks[1], 0, dh + 1))
    topright = (ri(ks[2], width - dw - 1, width), ri(ks[3], 0, dh + 1))
    botright = (ri(ks[4], width - dw - 1, width), ri(ks[5], height - dh - 1, height))
    botleft = (ri(ks[6], 0, dw + 1), ri(ks[7], height - dh - 1, height))
    startpoints = jnp.array(
        [[0.0, 0.0], [width - 1.0, 0.0], [width - 1.0, height - 1.0], [0.0, height - 1.0]],
        jnp.float32)
    endpoints = jnp.stack([jnp.stack(topleft), jnp.stack(topright),
                           jnp.stack(botright), jnp.stack(botleft)])
    return startpoints, endpoints


def _perspective_coeffs(startpoints, endpoints):
    """Homography coefficients mapping output coords (endpoints) -> input coords (startpoints)."""
    sx, sy = startpoints[:, 0], startpoints[:, 1]
    ex, ey = endpoints[:, 0], endpoints[:, 1]
    z = jnp.zeros_like(ex)
    o = jnp.ones_like(ex)
    rows_x = jnp.stack([ex, ey, o, z, z, z, -ex * sx, -ey * sx], axis=1)
    rows_y = jnp.stack([z, z, z, ex, ey, o, -ex * sy, -ey * sy], axis=1)
    A = jnp.concatenate([rows_x, rows_y], axis=0)          # (8, 8)
    rhs = jnp.concatenate([sx, sy], axis=0)                # (8,)
    return jnp.linalg.solve(A, rhs)


@functools.partial(jax.jit, static_argnames=("p", "distortion"))
def random_perspective(image, target, key, p=0.2, distortion=0.2):
    """Functional equivalent of RandomPerspective.forward."""
    image_f = image.astype(jnp.float32)
    masks_f = target["masks"].astype(jnp.float32)
    boxes_f = target["boxes"].astype(jnp.float32)
    C, H, W = image_f.shape
    M = masks_f.shape[0]

    k_outer, k_img, k_msk = jax.random.split(key, 3)
    outer_apply = jax.random.uniform(k_outer) <= p          # module skips if rand > p

    def _applied(args):
        img, msk, _ = args
        k_img_coin, k_img_pts = jax.random.split(k_img)
        k_msk_coin, k_msk_pts = jax.random.split(k_msk)
        # Each inner T.RandomPerspective call draws its own params and its own p=0.5 coin.
        img_flag = (jax.random.uniform(k_img_coin) < 0.5).astype(jnp.int32)
        msk_flag = (jax.random.uniform(k_msk_coin) < 0.5).astype(jnp.int32)
        sp_i, ep_i = _get_perspective_params(k_img_pts, H, W, distortion)
        sp_m, ep_m = _get_perspective_params(k_msk_pts, H, W, distortion)
        coeffs_img = _perspective_coeffs(sp_i, ep_i)
        coeffs_msk = _perspective_coeffs(sp_m, ep_m)

        planes = jnp.concatenate([img, msk], axis=0)                       # (C+M, H, W)
        coeffs = jnp.concatenate(
            [jnp.broadcast_to(coeffs_img[None, :], (C, 8)),
             jnp.broadcast_to(coeffs_msk[None, :], (M, 8))], axis=0)
        apply_f = jnp.concatenate(
            [jnp.broadcast_to(img_flag, (C,)), jnp.broadcast_to(msk_flag, (M,))])
        quant_f = jnp.concatenate(
            [jnp.zeros((C,), jnp.int32), jnp.ones((M,), jnp.int32)])

        warped, boxes_all = warp_and_boxes(planes, coeffs, apply_f, quant_f,
                                           distortion_bound=distortion)
        return warped[:C], warped[C:], boxes_all[C:]

    def _skipped(args):
        return args

    out_image, out_masks, out_boxes = lax.cond(
        outer_apply, _applied, _skipped, (image_f, masks_f, boxes_f))
    return out_image, {"masks": out_masks, "boxes": out_boxes}


# ----------------------------------------------------------------------------
if __name__ == "__main__":
    H = W = 16
    C = 3
    key = jax.random.PRNGKey(0)
    k_img_data, k_big, k_transform = jax.random.split(key, 3)

    image = jax.random.uniform(k_img_data, (C, H, W), jnp.float32)

    yy = jnp.arange(H)[:, None]
    xx = jnp.arange(W)[None, :]
    mask0 = ((yy >= 2) & (yy <= 9) & (xx >= 3) & (xx <= 11)).astype(jnp.float32)
    mask1 = ((yy >= 5) & (yy <= 13) & (xx >= 1) & (xx <= 6)).astype(jnp.float32)
    masks = jnp.stack([mask0, mask1], axis=0)                  # (2, 16, 16)

    expected = jnp.array([[3.0, 2.0, 11.0, 9.0], [1.0, 5.0, 6.0, 13.0]], jnp.float32)
    boxes = masks_to_boxes(masks)                              # single row-tile path
    boxes_tiled = masks_to_boxes(masks, tile_h=8)              # cross-tile accumulation
    assert bool(jnp.allclose(boxes, expected)), "masks_to_boxes mismatch"
    assert bool(jnp.allclose(boxes_tiled, expected)), "tiled box accumulation mismatch"

    # Lane-padding fallback path (W=20 has no 128-friendly row tiling).
    xx20 = jnp.arange(20)[None, :]
    mask_w20 = ((yy >= 3) & (yy <= 10) & (xx20 >= 2) & (xx20 <= 17)).astype(jnp.float32)
    boxes_w20 = masks_to_boxes(mask_w20[None])
    assert bool(jnp.allclose(
        boxes_w20, jnp.array([[2.0, 3.0, 17.0, 10.0]], jnp.float32))), \
        "padded-lane masks_to_boxes mismatch"

    # Identity homography with apply=1 must reproduce the input (bf16 MXU tolerance).
    ident = jnp.tile(jnp.asarray(_IDENTITY_COEFFS, jnp.float32)[None, :], (C, 1))
    warped_id, _ = warp_and_boxes(image, ident, jnp.ones((C,), jnp.int32), tile_h=8)
    assert bool(jnp.allclose(warped_id, image, atol=2e-2, rtol=2e-2)), "identity warp mismatch"

    # Banded source-row path: tall planes + identity warp with a tight distortion bound.
    tall = jax.random.uniform(k_big, (2, 64, 32), jnp.float32)
    ident2 = jnp.tile(jnp.asarray(_IDENTITY_COEFFS, jnp.float32)[None, :], (2, 1))
    warped_band, _ = warp_and_boxes(tall, ident2, jnp.ones((2,), jnp.int32),
                                    tile_h=8, distortion_bound=0.0)
    assert bool(jnp.allclose(warped_band, tall, atol=2e-2, rtol=2e-2)), "banded warp mismatch"

    target = {"masks": masks, "boxes": boxes}
    out_image, out_target = random_perspective(
        image, target, k_transform, p=0.2, distortion=0.2)
    jax.block_until_ready((out_image, out_target["masks"], out_target["boxes"]))

    assert out_image.shape == (C, H, W)
    assert out_target["masks"].shape == (2, H, W)
    assert out_target["boxes"].shape == (2, 4)
    print("KERNEL_OK")
</pallas_src>

<mosaic_0001>
module attributes {stable_mosaic.version = 11 : i64} {
  func.func @kernel(%arg0: i32, %arg1: i32, %arg2: memref<2x8xf32, #tpu.memory_space<smem>>, %arg3: memref<2x2xi32, #tpu.memory_space<smem>>, %arg4: memref<2x1xi32, #tpu.memory_space<smem>>, %arg5: memref<2x256xf32, #tpu.memory_space<vmem>>, %arg6: memref<1x16x16xbf16, #tpu.memory_space<vmem>>, %arg7: memref<1x1x256xf32, #tpu.memory_space<vmem>>, %arg8: memref<1x1x256xf32, #tpu.memory_space<vmem>>, %arg9: memref<1x1x4xf32, #tpu.memory_space<vmem>>) attributes {dimension_semantics = [#tpu.dimension_semantics<parallel>, #tpu.dimension_semantics<arbitrary>], iteration_bounds = array<i64: 2, 1>, scalar_prefetch = 0 : i64, scratch_operands = 0 : i64, tpu.core_type = #tpu.core_type<tc>, window_params = [{transform_indices = @transform_0, window_bounds = array<i64: 2, 8>}, {transform_indices = @transform_1, window_bounds = array<i64: 2, 2>}, {transform_indices = @transform_2, window_bounds = array<i64: 2, 1>}, {pipeline_mode = #tpu.pipeline_mode<synchronous>, transform_indices = @transform_3, window_bounds = array<i64: 2, 256>}, {transform_indices = @transform_4, window_bounds = array<i64: 1, 16, 16>}, {transform_indices = @transform_5, window_bounds = array<i64: 1, 1, 256>}, {transform_indices = @transform_6, window_bounds = array<i64: 1, 1, 256>}, {transform_indices = @transform_7, window_bounds = array<i64: 1, 1, 4>}]} {
    %0 = arith.index_cast %arg0 : i32 to index
    %c0 = arith.constant 0 : index
    %1 = memref.load %arg2[%0, %c0] : memref<2x8xf32, #tpu.memory_space<smem>>
    %2 = arith.index_cast %arg0 : i32 to index
    %c1 = arith.constant 1 : index
    %3 = memref.load %arg2[%2, %c1] : memref<2x8xf32, #tpu.memory_space<smem>>
    %4 = arith.index_cast %arg0 : i32 to index
    %c2 = arith.constant 2 : index
    %5 = memref.load %arg2[%4, %c2] : memref<2x8xf32, #tpu.memory_space<smem>>
    %6 = arith.index_cast %arg0 : i32 to index
    %c3 = arith.constant 3 : index
    %7 = memref.load %arg2[%6, %c3] : memref<2x8xf32, #tpu.memory_space<smem>>
    %8 = arith.index_cast %arg0 : i32 to index
    %c4 = arith.constant 4 : index
    %9 = memref.load %arg2[%8, %c4] : memref<2x8xf32, #tpu.memory_space<smem>>
    %10 = arith.index_cast %arg0 : i32 to index
    %c5 = arith.constant 5 : index
    %11 = memref.load %arg2[%10, %c5] : memref<2x8xf32, #tpu.memory_space<smem>>
    %12 = arith.index_cast %arg0 : i32 to index
    %c6 = arith.constant 6 : index
    %13 = memref.load %arg2[%12, %c6] : memref<2x8xf32, #tpu.memory_space<smem>>
    %14 = arith.index_cast %arg0 : i32 to index
    %c7 = arith.constant 7 : index
    %15 = memref.load %arg2[%14, %c7] : memref<2x8xf32, #tpu.memory_space<smem>>
    %c16_i32 = arith.constant 16 : i32
    %16 = arith.muli %arg1, %c16_i32 : i32
    %17 = arith.sitofp %16 : i32 to f32
    %c0_0 = arith.constant 0 : index
    %c0_1 = arith.constant 0 : index
    %18 = vector.load %arg5[%c0_0, %c0_1] : memref<2x256xf32, #tpu.memory_space<vmem>>, vector<1x256xf32>
    %c1_2 = arith.constant 1 : index
    %c0_3 = arith.constant 0 : index
    %19 = vector.load %arg5[%c1_2, %c0_3] : memref<2x256xf32, #tpu.memory_space<vmem>>, vector<1x256xf32>
    %20 = vector.broadcast %17 : f32 to vector<1x256xf32>
    %21 = arith.addf %19, %20 : vector<1x256xf32>
    %22 = vector.broadcast %13 : f32 to vector<1x256xf32>
    %23 = arith.mulf %22, %18 : vector<1x256xf32>
    %24 = vector.broadcast %15 : f32 to vector<1x256xf32>
    %25 = arith.mulf %24, %21 : vector<1x256xf32>
    %26 = arith.addf %23, %25 : vector<1x256xf32>
    %cst = arith.constant 1.000000e+00 : f32
    %27 = vector.broadcast %cst : f32 to vector<1x256xf32>
    %28 = arith.addf %26, %27 : vector<1x256xf32>
    %29 = tpu.reciprocal %28 {approx = true} : vector<1x256xf32> -> vector<1x256xf32>
    %30 = arith.mulf %28, %29 : vector<1x256xf32>
    %cst_4 = arith.constant 2.000000e+00 : f32
    %31 = vector.broadcast %cst_4 : f32 to vector<1x256xf32>
    %32 = arith.subf %31, %30 : vector<1x256xf32>
    %33 = arith.mulf %29, %32 : vector<1x256xf32>
    %34 = vector.broadcast %1 : f32 to vector<1x256xf32>
    %35 = arith.mulf %34, %18 : vector<1x256xf32>
    %36 = vector.broadcast %3 : f32 to vector<1x256xf32>
    %37 = arith.mulf %36, %21 : vector<1x256xf32>
    %38 = arith.addf %35, %37 : vector<1x256xf32>
    %39 = vector.broadcast %5 : f32 to vector<1x256xf32>
    %40 = arith.addf %38, %39 : vector<1x256xf32>
    %41 = arith.mulf %40, %33 : vector<1x256xf32>
    %42 = vector.broadcast %7 : f32 to vector<1x256xf32>
    %43 = arith.mulf %42, %18 : vector<1x256xf32>
    %44 = vector.broadcast %9 : f32 to vector<1x256xf32>
    %45 = arith.mulf %44, %21 : vector<1x256xf32>
    %46 = arith.addf %43, %45 : vector<1x256xf32>
    %47 = vector.broadcast %11 : f32 to vector<1x256xf32>
    %48 = arith.addf %46, %47 : vector<1x256xf32>
    %49 = arith.mulf %48, %33 : vector<1x256xf32>
    %c0_5 = arith.constant 0 : index
    %c0_6 = arith.constant 0 : index
    %c0_7 = arith.constant 0 : index
    %50 = vector.load %arg6[%c0_5, %c0_6, %c0_7] : memref<1x16x16xbf16, #tpu.memory_space<vmem>>, vector<1x16x16xbf16>
    %51 = vector.shape_cast %50 : vector<1x16x16xbf16> to vector<16x16xbf16>
    %52 = tpu.iota {dimensions = array<i32: 0>} : vector<16x1xi32>
    %53 = arith.sitofp %52 : vector<16x1xi32> to vector<16x1xf32>
    %54 = vector.broadcast %53 : vector<16x1xf32> to vector<16x256xf32>
    %55 = vector.broadcast %41 : vector<1x256xf32> to vector<16x256xf32>
    %56 = arith.subf %54, %55 : vector<16x256xf32>
    %57 = math.absf %56 : vector<16x256xf32>
    %cst_8 = arith.constant 1.000000e+00 : f32
    %58 = vector.broadcast %cst_8 : f32 to vector<16x256xf32>
    %59 = arith.subf %58, %57 : vector<16x256xf32>
    %cst_9 = arith.constant 0.000000e+00 : f32
    %60 = vector.broadcast %cst_9 : f32 to vector<16x256xf32>
    %61 = arith.maximumf %60, %59 : vector<16x256xf32>
    %62 = tpu.iota {dimensions = array<i32: 0>} : vector<16x1xi32>
    %63 = arith.sitofp %62 : vector<16x1xi32> to vector<16x1xf32>
    %cst_10 = arith.constant 0.000000e+00 : f32
    %64 = vector.broadcast %cst_10 : f32 to vector<16x1xf32>
    %65 = arith.addf %64, %63 : vector<16x1xf32>
    %66 = vector.broadcast %65 : vector<16x1xf32> to vector<16x256xf32>
    %67 = vector.broadcast %49 : vector<1x256xf32> to vector<16x256xf32>
    %68 = arith.subf %66, %67 : vector<16x256xf32>
    %69 = math.absf %68 : vector<16x256xf32>
    %cst_11 = arith.constant 1.000000e+00 : f32
    %70 = vector.broadcast %cst_11 : f32 to vector<16x256xf32>
    %71 = arith.subf %70, %69 : vector<16x256xf32>
    %cst_12 = arith.constant 0.000000e+00 : f32
    %72 = vector.broadcast %cst_12 : f32 to vector<16x256xf32>
    %73 = arith.maximumf %72, %71 : vector<16x256xf32>
    %74 = arith.truncf %61 : vector<16x256xf32> to vector<16x256xbf16>
    %cst_13 = arith.constant dense<0.000000e+00> : vector<16x256xf32>
    %75 = tpu.matmul %51, %74, %cst_13 {dimension_numbers = #tpu.dot_dimension_numbers<[1], [0], [0], [1], [0, 0, 1, 1], [], []>} : vector<16x16xbf16>, vector<16x256xbf16>, vector<16x256xf32> -> vector<16x256xf32>
    %76 = arith.mulf %73, %75 : vector<16x256xf32>
    %cst_14 = arith.constant dense<0.000000e+00> : vector<256xf32>
    %77 = vector.multi_reduction <add>, %76, %cst_14 [0] : vector<16x256xf32> to vector<256xf32>
    %78 = vector.shape_cast %77 : vector<256xf32> to vector<1x256xf32>
    %79 = arith.index_cast %arg0 : i32 to index
    %c0_15 = arith.constant 0 : index
    %80 = memref.load %arg3[%79, %c0_15] : memref<2x2xi32, #tpu.memory_space<smem>>
    %c0_i32 = arith.constant 0 : i32
    %81 = arith.cmpi sgt, %80, %c0_i32 : i32
    %82 = arith.index_cast %arg0 : i32 to index
    %c1_16 = arith.constant 1 : index
    %83 = memref.load %arg3[%82, %c1_16] : memref<2x2xi32, #tpu.memory_space<smem>>
    %c0_i32_17 = arith.constant 0 : i32
    %84 = arith.cmpi sgt, %83, %c0_i32_17 : i32
    %c0_18 = arith.constant 0 : index
    %c0_19 = arith.constant 0 : index
    %c0_20 = arith.constant 0 : index
    %85 = vector.load %arg7[%c0_18, %c0_19, %c0_20] : memref<1x1x256xf32, #tpu.memory_space<vmem>>, vector<1x1x256xf32>
    %86 = vector.shape_cast %85 : vector<1x1x256xf32> to vector<1x256xf32>
    %87 = arith.select %81, %78, %86 : vector<1x256xf32>
    %cst_21 = arith.constant 5.000000e-01 : f32
    %88 = vector.broadcast %cst_21 : f32 to vector<1x256xf32>
    %89 = arith.addf %87, %88 : vector<1x256xf32>
    %90 = math.floor %89 : vector<1x256xf32>
    %91 = arith.select %84, %90, %87 : vector<1x256xf32>
    %c0_22 = arith.constant 0 : index
    %c0_23 = arith.constant 0 : index
    %c0_24 = arith.constant 0 : index
    %92 = vector.load %arg8[%c0_22, %c0_23, %c0_24] : memref<1x1x256xf32, #tpu.memory_space<vmem>>, vector<1x1x256xf32>
    %93 = vector.shape_cast %92 : vector<1x1x256xf32> to vector<1x256xf32>
    %94 = vector.shape_cast %91 : vector<1x256xf32> to vector<1x1x256xf32>
    tpu.vector_store %arg8[%c0_22, %c0_23, %c0_24], %94 {strides = array<i32>} : memref<1x1x256xf32, #tpu.memory_space<vmem>>, vector<1x1x256xf32>,
    %cst_25 = arith.constant 1.600000e+01 : f32
    %95 = vector.broadcast %cst_25 : f32 to vector<1x256xf32>
    %96 = arith.cmpf olt, %18, %95 : vector<1x256xf32>
    %cst_26 = arith.constant 1.600000e+01 : f32
    %97 = vector.broadcast %cst_26 : f32 to vector<1x256xf32>
    %98 = arith.cmpf olt, %21, %97 : vector<1x256xf32>
    %99 = arith.andi %96, %98 : vector<1x256xi1>
    %cst_27 = arith.constant 0.000000e+00 : f32
    %100 = vector.broadcast %cst_27 : f32 to vector<1x256xf32>
    %101 = arith.cmpf ogt, %91, %100 : vector<1x256xf32>
    %102 = arith.andi %101, %99 : vector<1x256xi1>
    %cst_28 = arith.constant 1.000000e+09 : f32
    %103 = vector.broadcast %cst_28 : f32 to vector<1x256xf32>
    %104 = arith.select %102, %18, %103 : vector<1x256xi1>, vector<1x256xf32>
    %cst_29 = arith.constant dense<0x7F800000> : vector<1xf32>
    %105 = vector.multi_reduction <minimumf>, %104, %cst_29 [1] : vector<1x256xf32> to vector<1xf32>
    %106 = vector.shape_cast %105 : vector<1xf32> to vector<1x1xf32>
    %cst_30 = arith.constant 1.000000e+09 : f32
    %107 = vector.broadcast %cst_30 : f32 to vector<1x256xf32>
    %108 = arith.select %102, %21, %107 : vector<1x256xi1>, vector<1x256xf32>
    %cst_31 = arith.constant dense<0x7F800000> : vector<1xf32>
    %109 = vector.multi_reduction <minimumf>, %108, %cst_31 [1] : vector<1x256xf32> to vector<1xf32>
    %110 = vector.shape_cast %109 : vector<1xf32> to vector<1x1xf32>
    %cst_32 = arith.constant 0.000000e+00 : f32
    %111 = vector.broadcast %cst_32 : f32 to vector<1x256xf32>
    %112 = arith.subf %111, %18 : vector<1x256xf32>
    %cst_33 = arith.constant 1.000000e+09 : f32
    %113 = vector.broadcast %cst_33 : f32 to vector<1x256xf32>
    %114 = arith.select %102, %112, %113 : vector<1x256xi1>, vector<1x256xf32>
    %cst_34 = arith.constant dense<0x7F800000> : vector<1xf32>
    %115 = vector.multi_reduction <minimumf>, %114, %cst_34 [1] : vector<1x256xf32> to vector<1xf32>
    %116 = vector.shape_cast %115 : vector<1xf32> to vector<1x1xf32>
    %cst_35 = arith.constant 0.000000e+00 : f32
    %117 = vector.broadcast %cst_35 : f32 to vector<1x256xf32>
    %118 = arith.subf %117, %21 : vector<1x256xf32>
    %cst_36 = arith.constant 1.000000e+09 : f32
    %119 = vector.broadcast %cst_36 : f32 to vector<1x256xf32>
    %120 = arith.select %102, %118, %119 : vector<1x256xi1>, vector<1x256xf32>
    %cst_37 = arith.constant dense<0x7F800000> : vector<1xf32>
    %121 = vector.multi_reduction <minimumf>, %120, %cst_37 [1] : vector<1x256xf32> to vector<1xf32>
    %122 = vector.shape_cast %121 : vector<1xf32> to vector<1x1xf32>
    %123 = tpu.concatenate %106, %110, %116, %122 in 1 : vector<1x1xf32>, vector<1x1xf32>, vector<1x1xf32>, vector<1x1xf32> -> vector<1x4xf32>
    %c0_i32_38 = arith.constant 0 : i32
    %124 = arith.cmpi eq, %arg1, %c0_i32_38 : i32
    %125 = arith.extui %124 : i1 to i32
    %c0_i32_39 = arith.constant 0 : i32
    %126 = arith.cmpi ne, %125, %c0_i32_39 : i32
    scf.if %126 {
      %cst_48 = arith.constant 1.000000e+09 : f32
      %136 = vector.broadcast %cst_48 : f32 to vector<1x4xf32>
      %c0_49 = arith.constant 0 : index
      %c0_50 = arith.constant 0 : index
      %c0_51 = arith.constant 0 : index
      %137 = vector.load %arg9[%c0_49, %c0_50, %c0_51] : memref<1x1x4xf32, #tpu.memory_space<vmem>>, vector<1x1x4xf32>
      %138 = vector.shape_cast %137 : vector<1x1x4xf32> to vector<1x4xf32>
      %139 = vector.shape_cast %136 : vector<1x4xf32> to vector<1x1x4xf32>
      tpu.vector_store %arg9[%c0_49, %c0_50, %c0_51], %139 {strides = array<i32>} : memref<1x1x4xf32, #tpu.memory_space<vmem>>, vector<1x1x4xf32>,
    } else {
    }
    %c0_40 = arith.constant 0 : index
    %c0_41 = arith.constant 0 : index
    %c0_42 = arith.constant 0 : index
    %127 = vector.load %arg9[%c0_40, %c0_41, %c0_42] : memref<1x1x4xf32, #tpu.memory_space<vmem>>, vector<1x1x4xf32>
    %128 = vector.shape_cast %127 : vector<1x1x4xf32> to vector<1x4xf32>
    %129 = arith.minimumf %128, %123 : vector<1x4xf32>
    %c0_43 = arith.constant 0 : index
    %c0_44 = arith.constant 0 : index
    %c0_45 = arith.constant 0 : index
    %130 = vector.load %arg9[%c0_43, %c0_44, %c0_45] : memref<1x1x4xf32, #tpu.memory_space<vmem>>, vector<1x1x4xf32>
    %131 = vector.shape_cast %130 : vector<1x1x4xf32> to vector<1x4xf32>
    %132 = vector.shape_cast %129 : vector<1x4xf32> to vector<1x1x4xf32>
    tpu.vector_store %arg9[%c0_43, %c0_44, %c0_45], %132 {strides = array<i32>} : memref<1x1x4xf32, #tpu.memory_space<vmem>>, vector<1x1x4xf32>,
    %c0_i32_46 = arith.constant 0 : i32
    %133 = arith.cmpi eq, %arg1, %c0_i32_46 : i32
    %134 = arith.extui %133 : i1 to i32
    %c0_i32_47 = arith.constant 0 : i32
    %135 = arith.cmpi ne, %134, %c0_i32_47 : i32
    scf.if %135 {
      %c0_48 = arith.constant 0 : index
      %c0_49 = arith.constant 0 : index
      %c0_50 = arith.constant 0 : index
      %136 = vector.load %arg9[%c0_48, %c0_49, %c0_50] : memref<1x1x4xf32, #tpu.memory_space<vmem>>, vector<1x1x4xf32>
      %137 = vector.shape_cast %136 : vector<1x1x4xf32> to vector<1x4xf32>
      %138 = tpu.iota {dimensions = array<i32: 1>} : vector<1x4xi32>
      %c2_i32 = arith.constant 2 : i32
      %139 = vector.broadcast %c2_i32 : i32 to vector<1x4xi32>
      %140 = arith.cmpi slt, %138, %139 : vector<1x4xi32>
      %cst_51 = arith.constant 1.000000e+00 : f32
      %cst_52 = arith.constant -1.000000e+00 : f32
      %141 = vector.broadcast %cst_51 : f32 to vector<1x4xf32>
      %142 = vector.broadcast %cst_52 : f32 to vector<1x4xf32>
      %143 = arith.select %140, %141, %142 : vector<1x4xi1>, vector<1x4xf32>
      %cst_53 = arith.constant 5.000000e+08 : f32
      %144 = vector.broadcast %cst_53 : f32 to vector<1x4xf32>
      %145 = arith.cmpf olt, %137, %144 : vector<1x4xf32>
      %146 = arith.mulf %137, %143 : vector<1x4xf32>
      %cst_54 = arith.constant 0.000000e+00 : f32
      %147 = vector.broadcast %cst_54 : f32 to vector<1x4xf32>
      %148 = arith.select %145, %146, %147 : vector<1x4xi1>, vector<1x4xf32>
      %c0_55 = arith.constant 0 : index
      %c0_56 = arith.constant 0 : index
      %c0_57 = arith.constant 0 : index
      %149 = vector.load %arg9[%c0_55, %c0_56, %c0_57] : memref<1x1x4xf32, #tpu.memory_space<vmem>>, vector<1x1x4xf32>
      %150 = vector.shape_cast %149 : vector<1x1x4xf32> to vector<1x4xf32>
      %151 = vector.shape_cast %148 : vector<1x4xf32> to vector<1x1x4xf32>
      tpu.vector_store %arg9[%c0_55, %c0_56, %c0_57], %151 {strides = array<i32>} : memref<1x1x4xf32, #tpu.memory_space<vmem>>, vector<1x1x4xf32>,
    } else {
    }
    return
  }
  func.func @transform_0(%arg0: i32, %arg1: i32) -> (i32, i32) {
    %c0_i32 = arith.constant 0 : i32
    %c0_i32_0 = arith.constant 0 : i32
    %c0_i32_1 = arith.constant 0 : i32
    return %c0_i32, %c0_i32_0 : i32, i32
  }
  func.func @transform_1(%arg0: i32, %arg1: i32) -> (i32, i32) {
    %c0_i32 = arith.constant 0 : i32
    %c0_i32_0 = arith.constant 0 : i32
    %c0_i32_1 = arith.constant 0 : i32
    return %c0_i32, %c0_i32_0 : i32, i32
  }
  func.func @transform_2(%arg0: i32, %arg1: i32) -> (i32, i32) {
    %c0_i32 = arith.constant 0 : i32
    %c0_i32_0 = arith.constant 0 : i32
    %c0_i32_1 = arith.constant 0 : i32
    return %c0_i32, %c0_i32_0 : i32, i32
  }
  func.func @transform_3(%arg0: i32, %arg1: i32) -> (i32, i32) {
    %c0_i32 = arith.constant 0 : i32
    %c0_i32_0 = arith.constant 0 : i32
    %c0_i32_1 = arith.constant 0 : i32
    return %c0_i32, %c0_i32_0 : i32, i32
  }
  func.func @transform_4(%arg0: i32, %arg1: i32) -> (i32, i32, i32) {
    %c0_i32 = arith.constant 0 : i32
    %c0_i32_0 = arith.constant 0 : i32
    %c0_i32_1 = arith.constant 0 : i32
    return %arg0, %c0_i32, %c0_i32_0 : i32, i32, i32
  }
  func.func @transform_5(%arg0: i32, %arg1: i32) -> (i32, i32, i32) {
    %c0_i32 = arith.constant 0 : i32
    %c0_i32_0 = arith.constant 0 : i32
    return %arg0, %c0_i32, %arg1 : i32, i32, i32
  }
  func.func @transform_6(%arg0: i32, %arg1: i32) -> (i32, i32, i32) {
    %c0_i32 = arith.constant 0 : i32
    %c0_i32_0 = arith.constant 0 : i32
    return %arg0, %c0_i32, %arg1 : i32, i32, i32
  }
  func.func @transform_7(%arg0: i32, %arg1: i32) -> (i32, i32, i32) {
    %c0_i32 = arith.constant 0 : i32
    %c0_i32_0 = arith.constant 0 : i32
    %c0_i32_1 = arith.constant 0 : i32
    return %arg0, %c0_i32, %c0_i32_0 : i32, i32, i32
  }
}

</mosaic_0001>

<bundles_post_ra>
// kernel: tpu_custom_call.1
= control target key start
LH: loop header
LB: loop body
LE: loop exit
PB: predicated region body
PF: predicated region fallthrough
CT: control target
= control target key end

     0   :  { %s1623_s0 = inlined_call_operand.hbm [shape: f32[2,8], index: 0, kind: input, shape index: {}]   ;;  %s1624_s1 = inlined_call_operand.hbm [shape: s32[2,2], index: 1, kind: input, shape index: {}]   ;;  %s1625_s2 = inlined_call_operand.vmem [shape: s32[2,1], index: 2, kind: input, shape index: {}]   ;;  %s1626_s3 = inlined_call_operand.vmem [shape: f32[2,256], index: 3, kind: input, shape index: {}]   ;;  %s1627_s4 = inlined_call_operand.hbm [shape: bf16[2,16,16], index: 4, kind: input, shape index: {}]   ;;  %s1628_s5 = inlined_call_operand.hbm [shape: f32[2,1,256], index: 5, kind: input, shape index: {}]   ;;  %s1629_s6 = inlined_call_operand.hbm [shape: f32[2,1,256], index: 6, kind: output, shape index: {0}]   ;;  %s1630_s7 = inlined_call_operand.hbm [shape: f32[2,1,4], index: 7, kind: output, shape index: {1}]  }
   0x1   :  { %1634 = sst [smem:[#allocation25_spill]] %s1623_s0 }
   0x2   :  { %1635 = sst [smem:[#allocation26_spill]] %s1624_s1 }
   0x3   :  { %1636 = sst [smem:[#allocation27_spill]] %s1625_s2 }
   0x4   :  { %1637 = sst [smem:[#allocation28_spill]] %s1627_s4 }
   0x5   :  { %13 = vsyncpa [#allocation5], 0 }
   0x6   :  { %14 = vsyncpa [#allocation8], 0 }
   0x7   :  { %15 = vsyncpa [#allocation6], 0 }
   0x8   :  { %16 = vsyncpa [#allocation3], 0 }
   0x9   :  { %18 = vsyncpa [#allocation3 + $0x1], 0 }
   0xa   :  { %19 = vsyncpa [#allocation12], 0 }
   0xb   :  { %21 = vsyncpa [#allocation12 + $0x1], 0 }
   0xc   :  { %22 = vsyncpa [#allocation4], 0 }
   0xd   :  { %24 = vsyncpa [#allocation4 + $0x1], 0 }
   0xe   :  { %25 = vsyncpa [#allocation15], 0 }
   0xf   :  { %27 = vsyncpa [#allocation15 + $0x1], 0  ;;  %s1321_s24 = smov 0   ;;  %s1323_s25 = smov 0  }
  0x10   :  { %s1325_s26 = smov 0   ;;  %s1327_s27 = smov 0  }
  0x11   :  { %s1329_s28 = smov 0   ;;  %s1331_s29 = smov 0  }
  0x12 LB: > { %s893_s30 = sadd.s32 4294967295, %s1271_s29   ;;  %s894_s8 = sadd.s32 4294967294, %s1271_s29   ;;  %s1271_s29 = sphi %s1331_s29, %s33_s29   ;;  %s1267_s28 = sphi %s1329_s28, %s1668_s28   ;;  %s1263_s27 = sphi %s1327_s27, %s1667_s27   ;;  %s1259_s26 = sphi %s1325_s26, %s1666_s26   ;;  %s1255_s25 = sphi %s1323_s25, %s1665_s25   ;;  %s1251_s24 = sphi %s1321_s24, %s1664_s24  }
  0x13   : > { %p143_p0 = scmp.ne.s32.totalorder %s1259_s26, %s1255_s25  ;;  %p144_p1 = scmp.eq.s32.totalorder %s1271_s29, 0 }
  0x14   : > { %p149_p2 = scmp.ne.s32.totalorder %s1255_s25, %s1251_s24  ;;  %p1359_p3 = scmp.eq.s32.totalorder %s893_s30, 0 }
  0x15   : > { %p203_p4 = scmp.eq.s32.totalorder %s893_s30, 1  ;;  %p1363_p5 = por %p144_p1, %p143_p0 }
  0x16   : > { %p209_p6 = scmp.eq.s32.totalorder %s894_s8, 1  ;;  %p1369_p7 = por %p1359_p3, %p149_p2 }
  0x17   : > { %p1373_p8 = por %p203_p4, %p143_p0  ;;  %p895_p10 = scmp.ge.s32.totalorder %s1271_s29, 1 }
  0x18   : > { %p1377_p9 = por %p209_p6, %p149_p2  ;;  %p242_p11 = scmp.lt.s32.totalorder %s1271_s29, 3 }
  0x19   : > { %s1643_s0 = sld [smem:[#allocation25_spill]]  ;;  %p899_p13 = scmp.ge.s32.totalorder %s1271_s29, 2 }
  0x1a   : > { %p1386_p12 = pnand %p895_p10, %p242_p11  ;;  %s1645_s1 = sld [smem:[#allocation26_spill]] }
  0x1b   : > { %s1646_s2 = sld [smem:[#allocation27_spill]]  ;;  %s1273_s8 = smov [#allocation2]  }
  0x1c   : > { %p946_p0 = pneg %p1386_p12  ;;  %s1274_s15 = smov [#allocation7]  }
  0x1d   : > { %s1275_s16 = smov [#allocation9]   ;;  %s45_s19 = sadd.s32 1, %s1267_s28 }
  0x1e   : > { %p947_p1 = pnand %p946_p0, %p1359_p3  ;;  %p973_p2 = scmp.lt.s32.totalorder %s1271_s29, 2 }
  0x1f   : > { %s254_s17 = sshll.u32 %s1643_s0, 4  ;;  %p47_p4 = scmp.ge.s32.totalorder %s45_s19, 2  ;;  %s255_s17 = int_to_ptr.hbm [resolvable:$true] %s254_s17 }
  0x20   : > { %s264_s21 = sshll.u32 %s1645_s1, 4  ;;  %s1404_s20 = sand.u32 1, %s1259_s26   ;;  %s265_s21 = int_to_ptr.hbm [resolvable:$true] %s264_s21 }
  0x21   : > { %s274_s30 = sshll.u32 %s1646_s2, 4  ;;  %s900_s22 = sshll.u32 %s1404_s20, 3  ;;  %s275_s30 = int_to_ptr.vmem [resolvable:$true] %s274_s30 }
  0x22   : > { %949 = dma.hbm_to_smem (!%p947_p1), %s255_s17, 32, %s1273_s8, [#allocation5]  }
  0x23   : > { %952 = dma.hbm_to_smem (!%p947_p1), %s265_s21, 32, %s1274_s15, [#allocation8]  }
  0x24   : > { %955 = dma.vmem_to_smem (!%p947_p1), %s275_s30, 32, %s1275_s16, [#allocation6]  }
  0x25   : > { %s1670_s19 = smov (%p47_p4, %s45_s19), 0  ;;  %s924_s17 = sshll.u32 %s1267_s28, 3 }
  0x26   : > { %1647 = sst [smem:[#allocation23_spill]] %s1670_s19  ;;  %s133_s21 = ssub.s32 %s1267_s28, %s1670_s19 }
  0x27   : > { %s1648_s4 = sld [smem:[#allocation28_spill]]  ;;  %p134_p6 = scmp.eq.s32.totalorder %s133_s21, 0 }
  0x28   : > { %s292_s16 = scalar_lea.vmem [#allocation10], %s900_s22  ;;  %s1649_s0 = sadd.s32 1, %s1259_s26 }
  0x29   : > { %s300_s9 = sshll.u32 %s292_s16, 4  ;;  %p1424_p10 = pnand %p973_p2, %p1363_p5  ;;  %s301_s9 = int_to_ptr.vmem [resolvable:$true] %s300_s9 }
  0x2a   : > { %s1418_s1 = scalar_select %p134_p6, %s1259_s26, %s1649_s0  }
  0x2b   : > { %s289_s23 = scalar_lea.sflag [#allocation3], %s1404_s20  ;;  %s1277_s21 = smov 4  }
  0x2c   : > { %1650 = sst [smem:[#allocation24_spill]] %s1418_s1  ;;  %s903_s22 = sshll.u32 %s1404_s20, 1 }
  0x2d   : > { %s297_s30 = scalar_lea.hbm %s1648_s4, %s924_s17  ;;  %s1276_s17 = smov 64  }
  0x2e   : > { %s298_s15 = sshll.u32 %s297_s30, 4  ;;  %s904_s8 = sshll.u32 %s1267_s28, 1  ;;  %s299_s15 = int_to_ptr.hbm [resolvable:$true] %s298_s15 }
  0x2f   : > { %959 = dma.hbm_to_vmem [thread:$0]  (!%p1424_p10), %s299_s15, 128, %s301_s9, %s289_s23, %s1276_s17, %s1276_s17, %s1277_s21  }
  0x30   : > { %s320_s0 = scalar_lea.hbm %s1628_s5, %s904_s8  ;;  %s314_s11 = scalar_lea.vmem [#allocation11], %s903_s22 }
  0x31   : > { %s322_s4 = sshll.u32 %s320_s0, 4  ;;  %s324_s19 = sshll.u32 %s314_s11, 4  ;;  %s323_s4 = int_to_ptr.hbm [resolvable:$true] %s322_s4  ;;  %s325_s19 = int_to_ptr.vmem [resolvable:$true] %s324_s19 }
  0x32   : > { %s311_s1 = scalar_lea.sflag [#allocation12], %s1404_s20  ;;  %333 = sbr.rel (%p1386_p12) target bundleno = 421 (0x1a5), region = 44 }
  0x33   : > { %962 = dma.hbm_to_vmem [thread:$0]  (!%p1424_p10), %s323_s4, 32, %s325_s19, %s311_s1  }
  0x37   : > { %1222 = dma.done.wait (%p1359_p3), [#allocation5], 32  }
  0x38   : > { %1224 = vsyncadd (%p1359_p3), [#allocation5], 4294967264 }
  0x39   : > { %1226 = dma.done.wait (%p1359_p3), [#allocation8], 32  }
  0x3a   : > { %1228 = vsyncadd (%p1359_p3), [#allocation8], 4294967264 }
  0x3b   : > { %1230 = dma.done.wait (%p1359_p3), [#allocation6], 32  }
  0x3c   : > { %1232 = vsyncadd (%p1359_p3), [#allocation6], 4294967264  ;;  %s1454_s1 = sand.u32 1, %s1255_s25  }
  0x3d   : > { %s909_s2 = sshll.u32 %s1454_s1, 3  ;;  %s351_s4 = scalar_lea.sflag [#allocation3], %s1454_s1 }
  0x3e   : > { %s1458_s9 = scalar_lea.vmem [#allocation10], %s909_s2 }
  0x3f   : > { %1234 = dma.done.wait (%p1369_p7), %s351_s4, 128  }
  0x40   : > { %1236 = vsyncadd (%p1369_p7), %s351_s4, 4294967168  ;;  %s1632_s10 = sshll.u32 %s1454_s1, 1  ;;  %s361_s18 = scalar_lea.sflag [#allocation12], %s1454_s1 }
  0x41   : > { %s1468_s19 = scalar_lea.vmem [#allocation11], %s1632_s10 }
  0x42   : > { %1238 = dma.done.wait (%p1369_p7), %s361_s18, 32  }
  0x43   : > { %1240 = vsyncadd (%p1369_p7), %s361_s18, 4294967264 }
  0x44   : > { %370 = sfence }
  0x45   : > { %s1475_s20 = sshll.u32 %s1263_s27, 7  ;;  %v1488_v0 = vld [vmem:[%s1626_s3] ss:$2 sm:$0x3]  ;;  %v460_v12 = vlaneseq  ;;  %vm516_vm0 = vcmask 130048   ;;  %vm593_vm6 = vcmask 1040384  }
  0x46   : > { %s1633_s15 = sadd.s32 1, %s1475_s20  ;;  %s421_s23 = sadd.s32 6, %s1475_s20  ;;  %v1493_v1 = vld [vmem:[%s1626_s3 + $0x1] ss:$2 sm:$0x3]  ;;  %vm601_vm1 = vcmp.lt.f32.partialorder %v1488_v0, 16.0 }
  0x47   : > { %s422_s17 = sld [smem:[#allocation2 + %s421_s23]]  ;;  %s423_s21 = sadd.s32 7, %s1475_s20  ;;  %v461_v18 = vshrl.u32 %v460_v12, 7  ;;  %v925_v53 = vld [vmem:[%s1458_s9] sm:$0xff]  ;;  %vm602_vm2 = vcmp.lt.f32.partialorder %v1493_v1, 16.0  ;;  %vm1528_vm12 = vcmp.lt.s32.totalorder %v460_v12, 256 }
  0x48   : > { %s424_s22 = sld [smem:[#allocation2 + %s423_s21]]  ;;  %s415_s12 = sadd.s32 3, %s1475_s20  ;;  %vm603_vm3 = vmand %vm601_vm1, %vm602_vm2 }
  0x49   : > { %s410_s8 = sld [smem:[#allocation2 + %s1475_s20]]  ;;  %s417_s30 = sadd.s32 4, %s1475_s20  ;;  %v462_v26 = vadd.s32 8, %v461_v18  ;;  %v463_v30 = vcvt.s32.f32 %v461_v18 }
  0x4a   : > { %s412_s16 = sld [smem:[#allocation2 + %s1633_s15]]  ;;  %s413_s21 = sadd.s32 2, %s1475_s20 }
  0x4b   : > { %s416_s2 = sld [smem:[#allocation2 + %s415_s12]]  ;;  %s419_s10 = sadd.s32 5, %s1475_s20  ;;  %v464_v31 = vcvt.s32.f32 %v462_v26 }
  0x4c   : > { %s418_s23 = sld [smem:[#allocation2 + %s417_s30]]  ;;  %s692_s4 = scalar_lea.sflag [#allocation4], %s1454_s1 }
  0x4d   : > { %v432_v2 = vstv %s422_s17  ;;  %s414_s15 = sld [smem:[#allocation2 + %s413_s21]] }
  0x4e   : > { %v433_v3 = vmul.f32 %v432_v2, %v1488_v0  ;;  %v434_v4 = vstv %s424_s22  ;;  %s420_s12 = sld [smem:[#allocation2 + %s419_s10]]  ;;  %s1652_s10 = sadd.s32 1, %s1475_s20 }
  0x4f   : > { %v435_v5 = vmul.f32 %v1493_v1, %v434_v4  ;;  %v442_v8 = vstv %s410_s8  ;;  %s566_s9 = sld [smem:[#allocation7 + %s1475_s20]]  ;;  %s921_s8 = sshll.u32 %s1263_s27, 1 }
  0x50   : > { %v444_v9 = vstv %s412_s16  ;;  %v443_v13 = vmul.f32 %v442_v8, %v1488_v0  ;;  %s708_s0 = scalar_lea.hbm %s1629_s6, %s921_s8 }
  0x51   : > { %v436_v6 = vadd.f32 %v435_v5, %v433_v3  ;;  %v450_v10 = vstv %s416_s2  ;;  %v445_v14 = vmul.f32 %v1493_v1, %v444_v9  ;;  %s712_s2 = sshll.u32 %s708_s0, 4  ;;  %s713_s2 = int_to_ptr.hbm [resolvable:$true] %s712_s2 }
  0x52   : > { %v452_v11 = vstv %s418_s23  ;;  %v451_v15 = vmul.f32 %v450_v10, %v1488_v0  ;;  %s1155_s18 = sshra.s32 %s713_s2, 4  ;;  %s1156_s18 = int_to_ptr.hbm [resolvable:$true] %s1155_s18 }
  0x53   : > { %v437_v7 = vadd.f32 1.0, %v436_v6  ;;  %v453_v16 = vmul.f32 %v1493_v1, %v452_v11  ;;  %v446_v17 = vadd.f32 %v445_v14, %v443_v13  ;;  %v447_v21 = vstv %s414_s15  ;;  %s568_s15 = sld [smem:[#allocation7 + %s1652_s10]]  ;;  %s1157_s23 = scalar_lea.hbm %s1156_s18, 2 }
  0x54   : > { %v455_v22 = vstv %s420_s12  ;;  %p1158_p7 = scmp.ne.s32.totalorder %s1156_s18, %s1157_s23  ;;  %p1162_p0 = scmp.lt.s32.totalorder %s1156_s18, %s1629_s6 }
  0x55   : > { %1034 = vrcp.f32 %v437_v7  ;;  %v454_v19 = vadd.f32 %v453_v16, %v451_v15  ;;  %v448_v25 = vadd.f32 %v447_v21, %v446_v17  ;;  %p567_p3 = scmp.gt.s32.totalorder %s566_s9, 0  ;;  %s1161_s9 = scalar_lea.hbm %s1629_s6, 4 }
  0x56   : > { %p1159_p11 = pnand %p1158_p7, %p1373_p8  ;;  %p1163_p1 = scmp.lt.s32.totalorder %s1161_s9, %s1157_s23 }
  0x57   : > { %v456_v27 = vadd.f32 %v455_v22, %v454_v19  ;;  %s571_s17 = scalar_select %p567_p3, 1, 0 }
  0x58   : > { %p1160_p12 = pneg %p1159_p11  ;;  %p1164_p2 = por %p1163_p1, %p1162_p0 }
  0x59   : > { %p569_p5 = scmp.gt.s32.totalorder %s568_s15, 0 }
  0x5a   : > { %p1165_p4 = pnand %p1164_p2, %p1160_p12 }
  0x5b   : > { %v1035_v20 = vpop.eup %1034  ;;  %s585_s20 = scalar_select %p569_p5, 1, 0 }
  0x5c   : > { %v439_v23 = vmul.f32 %v1035_v20, %v437_v7 }
  0x5e   : > { %v440_v24 = vsub.f32 2.0, %v439_v23 }
  0x60   : > { %v441_v28 = vmul.f32 %v1035_v20, %v440_v24 }
  0x62   : > { %v449_v29 = vmul.f32 %v448_v25, %v441_v28  ;;  %v457_v32 = vmul.f32 %v456_v27, %v441_v28  ;;  %v570_v27 = vld [vmem:[%s1468_s19] sm:$0x3]  ;;  %s1661_s19 = sshll.u32 %s1454_s1, 1 }
  0x63   : > { %s399_s22 = scalar_lea.vmem [#allocation13], %s1661_s19 }
  0x64   : > { %v466_v33 = vperm.slane %v449_v29, 0  ;;  %v467_v34 = vperm.slane %v449_v29, 1  ;;  %v489_v54 = vperm.slane %v457_v32, 0  ;;  %v490_v55 = vperm.slane %v457_v32, 1  ;;  %s710_s11 = sshll.u32 %s399_s22, 4  ;;  %s711_s11 = int_to_ptr.vmem [resolvable:$true] %s710_s11 }
  0x65   : > { %v572_v29 = vstv %s571_s17  ;;  %v575_v32 = vperm.slane %v570_v27, 0 }
  0x66   : > { %v470_v35 = vsub.f32 %v463_v30, %v466_v33  ;;  %v472_v36 = vsub.f32 %v464_v31, %v466_v33  ;;  %v471_v37 = vsub.f32 %v463_v30, %v467_v34  ;;  %v473_v38 = vsub.f32 %v464_v31, %v467_v34 }
  0x67   : > { %v493_v56 = vsub.f32 %v463_v30, %v489_v54  ;;  %v495_v57 = vsub.f32 %v464_v31, %v489_v54  ;;  %v494_v58 = vsub.f32 %v463_v30, %v490_v55  ;;  %v496_v59 = vsub.f32 %v464_v31, %v490_v55 }
  0x68   : > { %v474_v39 = vand.u32 2147483647, %v470_v35  ;;  %v476_v40 = vand.u32 2147483647, %v472_v36  ;;  %v475_v41 = vand.u32 2147483647, %v471_v37 }
  0x69   : > { %v477_v42 = vand.u32 2147483647, %v473_v38  ;;  %v497_v60 = vand.u32 2147483647, %v493_v56  ;;  %v499_v61 = vand.u32 2147483647, %v495_v57 }
  0x6a   : > { %v478_v43 = vsub.f32 1.0, %v474_v39  ;;  %v480_v44 = vsub.f32 1.0, %v476_v40  ;;  %v479_v45 = vsub.f32 1.0, %v475_v41  ;;  %v498_v62 = vand.u32 2147483647, %v494_v58 }
  0x6b   : > { %v481_v46 = vsub.f32 1.0, %v477_v42  ;;  %v500_v63 = vand.u32 2147483647, %v496_v59  ;;  %v501_v3 = vsub.f32 1.0, %v497_v60  ;;  %v503_v5 = vsub.f32 1.0, %v499_v61 }
  0x6c   : > { %v482_v47 = vmax.f32 %v478_v43, 0.0  ;;  %v484_v48 = vmax.f32 %v480_v44, 0.0  ;;  %v483_v49 = vmax.f32 %v479_v45, 0.0  ;;  %v502_v6 = vsub.f32 1.0, %v498_v62 }
  0x6d   : > { %v485_v50 = vmax.f32 %v481_v46, 0.0  ;;  %v504_v7 = vsub.f32 1.0, %v500_v63  ;;  %v505_v8 = vmax.f32 %v501_v3, 0.0  ;;  %v507_v9 = vmax.f32 %v503_v5, 0.0 }
  0x6e   : > { %v509_v51 = vpack.c.bf16 %v484_v48, %v482_v47  ;;  %v506_v10 = vmax.f32 %v502_v6, 0.0  ;;  %v1278_v33 = vmov 0   ;;  %vm573_vm4 = vcmp.eq.s32.totalorder %v572_v29, 1 }
  0x6f   : > { %v510_v52 = vpack.c.bf16 %v485_v50, %v483_v49  ;;  %v508_v11 = vmax.f32 %v504_v7, 0.0  ;;  %v606_v34 = vsel %vm603_vm3, 1, %v1278_v33  ;;  %v576_v36 = vperm.slane %v570_v27, 1 }
  0x70   : > { %527 = vmatpush.bf16.msra.mxu0 %v509_v51  ;;  %v586_v39 = vstv %s585_s20  ;;  %v607_v40 = vperm.slane %v606_v34, 0  ;;  %v637_v42 = vsub.f32 0.0, %v1488_v0  ;;  %v650_v43 = vsub.f32 0.0, %v1493_v1 }
  0x71   : > { %541 = vmatpush.bf16.msra.mxu1 %v510_v52  ;;  %v608_v46 = vperm.slane %v606_v34, 1  ;;  %vm587_vm5 = vcmp.eq.s32.totalorder %v586_v39, 1  ;;  %v614_v52 = vperm.slane %v1488_v0, 0  ;;  %v615_v56 = vperm.slane %v1488_v0, 1 }
  0x72   : > { %vm1513_vm7 = vcmp.ne.s32.totalorder %v607_v40, 0  ;;  %v639_v51 = vperm.slane %v637_v42, 0  ;;  %v640_v55 = vperm.slane %v637_v42, 1  ;;  %v653_v58 = vperm.slane %v650_v43, 1 }
  0x73   : > { %918 = vmatmul.msk.bf16.vlgmr.msra.gmra.mxu0 %vm516_vm0, %v925_v53  ;;  %vm610_vm8 = vcmp.ne.s32.totalorder %v608_v46, 0  ;;  %v626_v59 = vperm.slane %v1493_v1, 0  ;;  %v627_v62 = vperm.slane %v1493_v1, 1 }
  0x74   : > { %919 = vmatmul.msk.bf16.vlgmr.msra.gmra.mxu1 %vm516_vm0, %v925_v53  ;;  %v652_v53 = vperm.slane %v650_v43, 0 }
  0xf0   : > { %v529_v2 = vpop.f32.mrf.mxu0 }
  0xf1   : > { %v543_v4 = vpop.f32.mrf.mxu1  ;;  %v548_v14 = vmul.f32 %v529_v2, %v505_v8 }
  0xf2   : > { %v549_v17 = vmul.f32 %v543_v4, %v506_v10 }
  0xf8   : > { %v531_v13 = vpop.f32.mrf.mxu0 }
  0xf9   : > { %v550_v15 = vmul.f32 %v531_v13, %v507_v9  ;;  %v545_v16 = vpop.f32.mrf.mxu1 }
  0xfa   : > { %v551_v18 = vmul.f32 %v545_v16, %v508_v11 }
  0xfb   : > { %v552_v19 = vadd.f32 %v550_v15, %v548_v14 }
  0xfc   : > { %v559_v20 = vadd.f32 %v551_v18, %v549_v17 }
  0xfd   : > { %v553_v21 = vrot.slane %v552_v19, 4 }
  0xfe   : > { %v560_v22 = vrot.slane %v559_v20, 4 }
  0xff   : > { %v554_v23 = vadd.f32 %v553_v21, %v552_v19 }
 0x100   : > { %v561_v24 = vadd.f32 %v560_v22, %v559_v20 }
 0x101   : > { %v555_v25 = vrot.slane %v554_v23, 2 }
 0x102   : > { %v562_v26 = vrot.slane %v561_v24, 2 }
 0x103   : > { %v556_v28 = vadd.f32 %v555_v25, %v554_v23 }
 0x104   : > { %v563_v30 = vadd.f32 %v562_v26, %v561_v24 }
 0x105   : > { %v557_v31 = vrot.slane %v556_v28, 1 }
 0x106   : > { %v564_v35 = vrot.slane %v563_v30, 1 }
 0x107   : > { %v558_v37 = vadd.f32 %v557_v31, %v556_v28 }
 0x108   : > { %v565_v38 = vadd.f32 %v564_v35, %v563_v30 }
 0x109   : > { %v579_v41 = vsel %vm573_vm4, %v558_v37, %v575_v32 }
 0x10a   : > { %v580_v44 = vsel %vm573_vm4, %v565_v38, %v576_v36  ;;  %v581_v45 = vadd.f32 0.5, %v579_v41 }
 0x10b   : > { %v582_v47 = vadd.f32 0.5, %v580_v44 }
 0x10c   : > { %v583_v48 = vfloor.f32 %v581_v45 }
 0x10d   : > { %v584_v50 = vfloor.f32 %v582_v47 }
 0x10e   : > { %v588_v54 = vsel %vm587_vm5, %v583_v48, %v579_v41 }
 0x10f   : > { %v589_v57 = vsel %vm587_vm5, %v584_v50, %v580_v44  ;;  %vm604_vm9 = vcmp.gt.f32.partialorder %v588_v54, 0.0 }
 0x110   : > { %v592_v60 = vrot.slane %v589_v57, 7  ;;  %vm605_vm10 = vcmp.gt.f32.partialorder %v589_v57, 0.0  ;;  %vm1522_vm11 = vmand %vm604_vm9, %vm1513_vm7 }
 0x111   : > { %vm1532_vm13 = vmand %vm605_vm10, %vm610_vm8  ;;  %v643_v2 = vsel %vm1522_vm11, %v639_v51, 1e+09  ;;  %v618_v3 = vsel %vm1522_vm11, %v614_v52, 1e+09  ;;  %v656_v4 = vsel %vm1522_vm11, %v652_v53, 1e+09 }
 0x112   : > { %v644_v1 = vsel %vm1532_vm13, %v640_v55, 1e+09  ;;  %v645_v5 = vsel %vm593_vm6, %v643_v2, inf  ;;  %v619_v6 = vsel %vm1532_vm13, %v615_v56, 1e+09  ;;  %v620_v7 = vsel %vm593_vm6, %v618_v3, inf }
 0x113   : > { %v646_v8 = vsel %vm593_vm6, %v644_v1, inf  ;;  %v621_v9 = vsel %vm593_vm6, %v619_v6, inf  ;;  %v657_v10 = vsel %vm1532_vm13, %v653_v58, 1e+09  ;;  %v658_v11 = vsel %vm593_vm6, %v656_v4, inf }
 0x114   : > { %v647_v13 = vmin.f32 %v645_v5, %v646_v8  ;;  %v622_v14 = vmin.f32 %v620_v7, %v621_v9  ;;  %v659_v15 = vsel %vm593_vm6, %v657_v10, inf  ;;  %v630_v16 = vsel %vm1522_vm11, %v626_v59, 1e+09 }
 0x115   : > { %v660_v17 = vmin.f32 %v658_v11, %v659_v15  ;;  %v631_v18 = vsel %vm1532_vm13, %v627_v62, 1e+09  ;;  %v632_v19 = vsel %vm593_vm6, %v630_v16, inf  ;;  %v594_v20 = vsel %vm593_vm6, %v588_v54, %v592_v60 }
 0x116   : > { %648 = vmin.xlane.f32.xlu1 %v647_v13  ;;  %623 = vmin.xlane.f32.xlu0 %v622_v14  ;;  %v633_v21 = vsel %vm593_vm6, %v631_v18, inf  ;;  %600 = vst.msk [vmem:[%s399_s22] sm:$0x3] %vm1528_vm12, %v594_v20 }
 0x117   : > { %v634_v22 = vmin.f32 %v632_v19, %v633_v21 }
 0x118   : > { %1168 = shalt.err (!%p1165_p4)
}
 0x119   : > { %942 = dma.vmem_to_hbm [thread:$0]  (%p1373_p8), %s711_s11, 32, %s713_s2, %s692_s4   ;;  %vm673_vm14 = vcmask 24576   ;;  %v1279_v23 = vmov 1e+09   ;;  %vm663_vm15 = vcmask 7168   ;;  %vm665_vm0 = vcmask 15360  }
 0x11a   : > { %s405_s17 = scalar_lea.vmem [#allocation14], %s1454_s1  ;;  %vm667_vm1 = vcmask 23552   ;;  %v684_v33 = vand.u32 127, %v460_v12  ;;  %s721_s22 = scalar_lea.hbm %s1630_s7, %s1263_s27  ;;  %v1280_v34 = vmov -1.0  }
 0x11b   : > { %674 = vst.msk [vmem:[%s405_s17] sm:$0x1] %vm673_vm14, %v1279_v23  ;;  %s723_s8 = sshll.u32 %s405_s17, 4  ;;  %s725_s30 = sshll.u32 %s721_s22, 4  ;;  %s724_s8 = int_to_ptr.vmem [resolvable:$true] %s723_s8  ;;  %s726_s30 = int_to_ptr.hbm [resolvable:$true] %s725_s30 }
 0x11c   : > { %vm685_vm2 = vcmp.lt.s32.totalorder %v684_v33, 2  ;;  %s697_s16 = scalar_lea.sflag [#allocation15], %s1454_s1  ;;  %s1183_s0 = sshra.s32 %s726_s30, 4  ;;  %s1184_s0 = int_to_ptr.hbm [resolvable:$true] %s1183_s0 }
 0x11d   : > { %v686_v35 = vsel %vm685_vm2, 1.0, %v1280_v34  ;;  %s1185_s11 = scalar_lea.hbm %s1184_s0, 1  ;;  %s1189_s4 = scalar_lea.hbm %s1630_s7, 2 }
 0x11e   : > { %661 = vmin.xlane.f32.xlu1 %v660_v17  ;;  %635 = vmin.xlane.f32.xlu0 %v634_v22  ;;  %p1186_p6 = scmp.ne.s32.totalorder %s1184_s0, %s1185_s11  ;;  %p1190_p5 = scmp.lt.s32.totalorder %s1184_s0, %s1630_s7 }
 0x11f   : > { %p1191_p7 = scmp.lt.s32.totalorder %s1189_s4, %s1185_s11 }
 0x120   : > { %p1187_p10 = pnand %p1186_p6, %p1373_p8 }
 0x121   : > { %p1192_p11 = por %p1191_p7, %p1190_p5 }
 0x122   : > { %v675_v28 = vld [vmem:[%s405_s17] sm:$0x1]  ;;  %p1188_p3 = pneg %p1187_p10 }
 0x124   : > { %p1193_p12 = pnand %p1192_p11, %p1188_p3 }
 0x189   : > { %v649_v24 = vpop.xlane.xlu1 %648  ;;  %v624_v25 = vpop.xlane.xlu0 %623 }
 0x191   : > { %v636_v26 = vpop.xlane.xlu0 %635  ;;  %v662_v29 = vpop.xlane.xlu1 %661 }
 0x192   : > { %v664_v27 = vsel %vm663_vm15, %v624_v25, %v636_v26 }
 0x193   : > { %v666_v30 = vsel %vm665_vm0, %v664_v27, %v649_v24 }
 0x194   : > { %v668_v31 = vsel %vm667_vm1, %v666_v30, %v662_v29 }
 0x195   : > { %v676_v32 = vmin.f32 %v675_v28, %v668_v31 }
 0x197   : > { %678 = vst.msk [vmem:[%s405_s17] sm:$0x1] %vm673_vm14, %v676_v32 }
 0x19e   : > { %v682_v36 = vld [vmem:[%s405_s17] sm:$0x1] }
 0x19f   : > { %vm687_vm3 = vcmp.lt.f32.partialorder %v682_v36, 5e+08  ;;  %v688_v37 = vmul.f32 %v686_v35, %v682_v36 }
 0x1a1   : > { %v689_v38 = vsel %vm687_vm3, %v688_v37, 0.0 }
 0x1a2   : > { %690 = vst.msk [vmem:[%s405_s17] sm:$0x1] %vm673_vm14, %v689_v38 }
 0x1a3   : > { %1196 = shalt.err (!%p1193_p12)
}
 0x1a4   : > { %943 = dma.vmem_to_hbm [thread:$0]  (%p1373_p8), %s724_s8, 16, %s726_s30, %s697_s16  }
 0x1a5 PF: > { %s737_s1 = sand.u32 1, %s1251_s24   ;;  %p964_p0 = pnand %p899_p13, %p1377_p9 }
 0x1a6   : > { %s738_s21 = scalar_lea.sflag [#allocation4], %s737_s1 }
 0x1a7   : > { %p965_p1 = pneg %p964_p0 }
 0x1a9   : > { %1242 = dma.done.wait (%p965_p1), %s738_s21, 32  }
 0x1aa   : > { %1244 = vsyncadd (%p965_p1), %s738_s21, 4294967264  ;;  %s748_s12 = scalar_lea.sflag [#allocation15], %s737_s1 }
 0x1ab   : > { %1246 = dma.done.wait (%p965_p1), %s748_s12, 16  }
 0x1ac   : > { %1248 = vsyncadd (%p965_p1), %s748_s12, 4294967280  ;;  %s33_s29 = sadd.s32 1, %s1271_s29   ;;  %s1662_s13 = sld [smem:[#allocation24_spill]] }
 0x1ad   : > { %p30_p2 = scmp.ge.s32.totalorder %s33_s29, 4   ;;  %s1663_s9 = sld [smem:[#allocation23_spill]] }
 0x1ae   : > { %s1664_s24 = smov %s1255_s25  ;;  %s1665_s25 = smov %s1259_s26 }
 0x1af   : > { %s1667_s27 = smov %s1267_s28  ;;  %32 = sbr.rel (!%p30_p2) target bundleno = 18 (0x12), region = 142 }
 0x1b2   : > { %s1666_s26 = smov %s1662_s13 }
 0x1b3   : > { %s1668_s28 = smov %s1663_s9 }
 0x1b4   :  { %753 = vsyncpa [#allocation3], 1 }
 0x1b5   :  { %755 = vsyncpa [#allocation3 + $0x1], 1 }
 0x1b6   :  { %756 = vsyncpa [#allocation12], 1 }
 0x1b7   :  { %758 = vsyncpa [#allocation12 + $0x1], 1 }
 0x1b8   :  { %759 = vsyncpa [#allocation4], 1 }
 0x1b9   :  { %761 = vsyncpa [#allocation4 + $0x1], 1 }
 0x1ba   :  { %762 = vsyncpa [#allocation15], 1 }
 0x1bb   :  { %764 = vsyncpa [#allocation15 + $0x1], 1 }
 0x1bc   :  { %765 = vsyncpa [#allocation5], 1 }
 0x1bd   :  { %767 = vsyncpa [#allocation5 + $0x1], 1 }
 0x1be   :  { %768 = vsyncpa [#allocation8], 1 }
 0x1bf   :  { %769 = vsyncpa [#allocation6], 1 }
 0x1c0   :  { %771 = vsyncpa [#allocation6 + $0x1], 1 }

</bundles_post_ra>
